<compile_context>
chip_gen: v7x
topology: tpu7x:2x2x1
jax: 0.10.0
libtpu: 0.0.40
codegen_flags: <defaults>
</compile_context>

<pallas_src>
import math

import jax
import jax.numpy as jnp
from jax import lax
from jax.experimental import pallas as pl
from jax.experimental.pallas import tpu as pltpu


def _round_up(x, m):
    return (x + m - 1) // m * m


def _lora_linear_kernel(x_ref, w_ref, a_ref, b_ref, bias_ref, o_ref,
                        acc_ref, xa_ref):
    k = pl.program_id(2)

    @pl.when(k == 0)
    def _():
        acc_ref[...] = jnp.zeros_like(acc_ref)
        xa_ref[...] = jnp.zeros_like(xa_ref)

    x = x_ref[...]
    # Base GEMM: x (tm, tk) . W (tn, tk) contracted on K -> (tm, tn).
    acc_ref[...] += lax.dot_general(
        x, w_ref[...],
        dimension_numbers=(((1,), (1,)), ((), ())),
        preferred_element_type=jnp.float32)
    # LoRA down-projection accumulated across K: (tm, tk).(rp, tk) -> (tm, rp).
    xa_ref[...] += lax.dot_general(
        x, a_ref[...],
        dimension_numbers=(((1,), (1,)), ((), ())),
        preferred_element_type=jnp.float32)

    @pl.when(k == pl.num_programs(2) - 1)
    def _():
        # Rank-r up-projection once per (i, j) tile: (tm, rp).(tn, rp) -> (tm, tn).
        # Scaling is already folded into B in the wrapper.
        lora = lax.dot_general(
            xa_ref[...].astype(b_ref.dtype), b_ref[...],
            dimension_numbers=(((1,), (1,)), ((), ())),
            preferred_element_type=jnp.float32)
        o_ref[...] = (acc_ref[...] + lora + bias_ref[...]).astype(o_ref.dtype)


def lora_linear(x, weight, bias, A, B, *, alpha=16,
                compute_dtype=jnp.bfloat16,
                tm_max=256, tn_max=256, tk_max=512):
    """Equivalent of LoRALinear.forward.

    x:      (..., in_features)
    weight: (out_features, in_features)   frozen nn.Linear weight
    bias:   (out_features,)               frozen nn.Linear bias
    A:      (r, in_features)
    B:      (out_features, r)
    """
    r = A.shape[0]
    scaling = alpha / r
    out_features, in_features = weight.shape

    lead = x.shape[:-1]
    M = math.prod(lead) if lead else 1
    x2d = x.reshape(M, in_features)

    # Tile sizes: MXU/lane dense, sized well under the v7x 32 MiB scoped VMEM.
    tm = min(tm_max, _round_up(M, 8))
    tn = min(tn_max, _round_up(out_features, 128))
    tk = min(tk_max, _round_up(in_features, 128))
    Mp = _round_up(M, tm)
    Np = _round_up(out_features, tn)
    Kp = _round_up(in_features, tk)
    rp = _round_up(r, 8)

    cd = compute_dtype
    # TODO(synk): in a real model, cast + scale-fold the frozen weights once at
    # parameter-load time (outside the forward) instead of per call.
    xp = jnp.pad(x2d.astype(cd), ((0, Mp - M), (0, Kp - in_features)))
    wp = jnp.pad(weight.astype(cd), ((0, Np - out_features), (0, Kp - in_features)))
    ap = jnp.pad(A.astype(cd), ((0, rp - r), (0, Kp - in_features)))
    bp = jnp.pad((B * scaling).astype(cd), ((0, Np - out_features), (0, rp - r)))
    biasp = jnp.pad(bias.astype(jnp.float32),
                    (0, Np - out_features)).reshape(1, Np)

    grid = (Mp // tm, Np // tn, Kp // tk)

    out = pl.pallas_call(
        _lora_linear_kernel,
        out_shape=jax.ShapeDtypeStruct((Mp, Np), x.dtype),
        grid_spec=pltpu.PrefetchScalarGridSpec(
            num_scalar_prefetch=0,
            grid=grid,
            in_specs=[
                pl.BlockSpec((tm, tk), lambda i, j, k: (i, k)),   # x
                pl.BlockSpec((tn, tk), lambda i, j, k: (j, k)),   # W  (out, in)
                pl.BlockSpec((rp, tk), lambda i, j, k: (0, k)),   # A  (r, in)
                pl.BlockSpec((tn, rp), lambda i, j, k: (j, 0)),   # B*scaling
                pl.BlockSpec((1, tn), lambda i, j, k: (0, j)),    # bias
            ],
            out_specs=pl.BlockSpec((tm, tn), lambda i, j, k: (i, j)),
            scratch_shapes=[
                pltpu.VMEM((tm, tn), jnp.float32),   # base GEMM accumulator
                pltpu.VMEM((tm, rp), jnp.float32),   # LoRA down-proj accumulator
            ],
        ),
        compiler_params=pltpu.CompilerParams(
            dimension_semantics=("parallel", "parallel", "arbitrary"),
            vmem_limit_bytes=32 * 1024 * 1024,
        ),
    )(xp, wp, ap, bp, biasp)

    return out[:M, :out_features].reshape(*lead, out_features)


def _reference(x, weight, bias, A, B, scaling, cd=jnp.bfloat16):
    # Same bf16 input rounding as the kernel, f32 accumulate.
    xf = x.astype(cd).astype(jnp.float32)
    wf = weight.astype(cd).astype(jnp.float32)
    af = A.astype(cd).astype(jnp.float32)
    bf = (B * scaling).astype(cd).astype(jnp.float32)
    return xf @ wf.T + bias + (xf @ af.T) @ bf.T


def _run_case(key, batch, seq, in_features, out_features, r, alpha):
    kx, kw, kb, ka, kB = jax.random.split(key, 5)
    x = jax.random.normal(kx, (batch, seq, in_features), dtype=jnp.float32)
    weight = jax.random.normal(kw, (out_features, in_features), jnp.float32) * 0.05
    bias = jax.random.normal(kb, (out_features,), jnp.float32) * 0.1
    # A initialized like the module (randn * 0.01); B nonzero here (module
    # inits it to zeros) so the LoRA path is actually exercised.
    A = jax.random.normal(ka, (r, in_features), jnp.float32) * 0.01
    B = jax.random.normal(kB, (out_features, r), jnp.float32) * 0.01

    out = jax.block_until_ready(lora_linear(x, weight, bias, A, B, alpha=alpha))
    ref = _reference(x, weight, bias, A, B, alpha / r)
    assert out.shape == (batch, seq, out_features)
    assert jnp.allclose(out, ref, atol=1e-2, rtol=1e-2), "mismatch vs reference"


if __name__ == "__main__":
    key = jax.random.PRNGKey(0)
    k1, k2 = jax.random.split(key)
    # Case 1: module-default tiny shapes (everything padded up internally).
    _run_case(k1, batch=2, seq=8, in_features=32, out_features=64, r=2, alpha=16)
    # Case 2: lane/MXU-aligned shapes exercising the full (M, N, K) grid.
    _run_case(k2, batch=2, seq=64, in_features=1024, out_features=512, r=2, alpha=16)
    print("KERNEL_OK")
</pallas_src>

<mosaic_0001>
module attributes {stable_mosaic.version = 11 : i64} {
  func.func @_lora_linear_kernel(%arg0: i32, %arg1: i32, %arg2: i32, %arg3: memref<16x128xbf16, #tpu.memory_space<vmem>>, %arg4: memref<128x128xbf16, #tpu.memory_space<vmem>>, %arg5: memref<8x128xbf16, #tpu.memory_space<vmem>>, %arg6: memref<128x8xbf16, #tpu.memory_space<vmem>>, %arg7: memref<1x128xf32, #tpu.memory_space<vmem>>, %arg8: memref<16x128xf32, #tpu.memory_space<vmem>>, %arg9: memref<16x128xf32, #tpu.memory_space<vmem>>, %arg10: memref<16x8xf32, #tpu.memory_space<vmem>>) attributes {dimension_semantics = [#tpu.dimension_semantics<parallel>, #tpu.dimension_semantics<parallel>, #tpu.dimension_semantics<arbitrary>], iteration_bounds = array<i64: 1, 1, 1>, scalar_prefetch = 0 : i64, scratch_operands = 2 : i64, tpu.core_type = #tpu.core_type<tc>, window_params = [{transform_indices = @transform_0, window_bounds = array<i64: 16, 128>}, {transform_indices = @transform_1, window_bounds = array<i64: 128, 128>}, {transform_indices = @transform_2, window_bounds = array<i64: 8, 128>}, {transform_indices = @transform_3, window_bounds = array<i64: 128, 8>}, {transform_indices = @transform_4, window_bounds = array<i64: 1, 128>}, {transform_indices = @transform_5, window_bounds = array<i64: 16, 128>}]} {
    %c0_i32 = arith.constant 0 : i32
    %0 = arith.cmpi eq, %arg2, %c0_i32 : i32
    %1 = arith.extui %0 : i1 to i32
    %c0_i32_0 = arith.constant 0 : i32
    %2 = arith.cmpi ne, %1, %c0_i32_0 : i32
    scf.if %2 {
      %cst_17 = arith.constant 0.000000e+00 : f32
      %17 = vector.broadcast %cst_17 : f32 to vector<16x128xf32>
      %c0_18 = arith.constant 0 : index
      %c0_19 = arith.constant 0 : index
      %18 = vector.load %arg9[%c0_18, %c0_19] : memref<16x128xf32, #tpu.memory_space<vmem>>, vector<16x128xf32>
      tpu.vector_store %arg9[%c0_18, %c0_19], %17 {strides = array<i32>} : memref<16x128xf32, #tpu.memory_space<vmem>>, vector<16x128xf32>,
      %cst_20 = arith.constant 0.000000e+00 : f32
      %19 = vector.broadcast %cst_20 : f32 to vector<16x8xf32>
      %c0_21 = arith.constant 0 : index
      %c0_22 = arith.constant 0 : index
      %20 = vector.load %arg10[%c0_21, %c0_22] : memref<16x8xf32, #tpu.memory_space<vmem>>, vector<16x8xf32>
      tpu.vector_store %arg10[%c0_21, %c0_22], %19 {strides = array<i32>} : memref<16x8xf32, #tpu.memory_space<vmem>>, vector<16x8xf32>,
    } else {
    }
    %c0 = arith.constant 0 : index
    %c0_1 = arith.constant 0 : index
    %3 = vector.load %arg3[%c0, %c0_1] : memref<16x128xbf16, #tpu.memory_space<vmem>>, vector<16x128xbf16>
    %c0_2 = arith.constant 0 : index
    %c0_3 = arith.constant 0 : index
    %4 = vector.load %arg9[%c0_2, %c0_3] : memref<16x128xf32, #tpu.memory_space<vmem>>, vector<16x128xf32>
    %c0_4 = arith.constant 0 : index
    %c0_5 = arith.constant 0 : index
    %5 = vector.load %arg4[%c0_4, %c0_5] : memref<128x128xbf16, #tpu.memory_space<vmem>>, vector<128x128xbf16>
    %cst = arith.constant dense<0.000000e+00> : vector<16x128xf32>
    %6 = tpu.matmul %3, %5, %cst {dimension_numbers = #tpu.dot_dimension_numbers<[1], [1], [0], [0], [0, 0, 1, 0], [], []>} : vector<16x128xbf16>, vector<128x128xbf16>, vector<16x128xf32> -> vector<16x128xf32>
    %7 = arith.addf %4, %6 : vector<16x128xf32>
    %c0_6 = arith.constant 0 : index
    %c0_7 = arith.constant 0 : index
    %8 = vector.load %arg9[%c0_6, %c0_7] : memref<16x128xf32, #tpu.memory_space<vmem>>, vector<16x128xf32>
    tpu.vector_store %arg9[%c0_6, %c0_7], %7 {strides = array<i32>} : memref<16x128xf32, #tpu.memory_space<vmem>>, vector<16x128xf32>,
    %c0_8 = arith.constant 0 : index
    %c0_9 = arith.constant 0 : index
    %9 = vector.load %arg10[%c0_8, %c0_9] : memref<16x8xf32, #tpu.memory_space<vmem>>, vector<16x8xf32>
    %c0_10 = arith.constant 0 : index
    %c0_11 = arith.constant 0 : index
    %10 = vector.load %arg5[%c0_10, %c0_11] : memref<8x128xbf16, #tpu.memory_space<vmem>>, vector<8x128xbf16>
    %cst_12 = arith.constant dense<0.000000e+00> : vector<16x8xf32>
    %11 = tpu.matmul %3, %10, %cst_12 {dimension_numbers = #tpu.dot_dimension_numbers<[1], [1], [0], [0], [0, 0, 1, 0], [], []>} : vector<16x128xbf16>, vector<8x128xbf16>, vector<16x8xf32> -> vector<16x8xf32>
    %12 = arith.addf %9, %11 : vector<16x8xf32>
    %c0_13 = arith.constant 0 : index
    %c0_14 = arith.constant 0 : index
    %13 = vector.load %arg10[%c0_13, %c0_14] : memref<16x8xf32, #tpu.memory_space<vmem>>, vector<16x8xf32>
    tpu.vector_store %arg10[%c0_13, %c0_14], %12 {strides = array<i32>} : memref<16x8xf32, #tpu.memory_space<vmem>>, vector<16x8xf32>,
    %c0_i32_15 = arith.constant 0 : i32
    %14 = arith.cmpi eq, %arg2, %c0_i32_15 : i32
    %15 = arith.extui %14 : i1 to i32
    %c0_i32_16 = arith.constant 0 : i32
    %16 = arith.cmpi ne, %15, %c0_i32_16 : i32
    scf.if %16 {
      %c0_17 = arith.constant 0 : index
      %c0_18 = arith.constant 0 : index
      %17 = vector.load %arg10[%c0_17, %c0_18] : memref<16x8xf32, #tpu.memory_space<vmem>>, vector<16x8xf32>
      %18 = arith.truncf %17 : vector<16x8xf32> to vector<16x8xbf16>
      %c0_19 = arith.constant 0 : index
      %c0_20 = arith.constant 0 : index
      %19 = vector.load %arg6[%c0_19, %c0_20] : memref<128x8xbf16, #tpu.memory_space<vmem>>, vector<128x8xbf16>
      %cst_21 = arith.constant dense<0.000000e+00> : vector<16x128xf32>
      %20 = tpu.matmul %18, %19, %cst_21 {dimension_numbers = #tpu.dot_dimension_numbers<[1], [1], [0], [0], [0, 0, 1, 0], [], []>} : vector<16x8xbf16>, vector<128x8xbf16>, vector<16x128xf32> -> vector<16x128xf32>
      %c0_22 = arith.constant 0 : index
      %c0_23 = arith.constant 0 : index
      %21 = vector.load %arg9[%c0_22, %c0_23] : memref<16x128xf32, #tpu.memory_space<vmem>>, vector<16x128xf32>
      %22 = arith.addf %21, %20 : vector<16x128xf32>
      %c0_24 = arith.constant 0 : index
      %c0_25 = arith.constant 0 : index
      %23 = vector.load %arg7[%c0_24, %c0_25] : memref<1x128xf32, #tpu.memory_space<vmem>>, vector<1x128xf32>
      %24 = vector.broadcast %23 : vector<1x128xf32> to vector<16x128xf32>
      %25 = arith.addf %22, %24 : vector<16x128xf32>
      %c0_26 = arith.constant 0 : index
      %c0_27 = arith.constant 0 : index
      %26 = vector.load %arg8[%c0_26, %c0_27] : memref<16x128xf32, #tpu.memory_space<vmem>>, vector<16x128xf32>
      tpu.vector_store %arg8[%c0_26, %c0_27], %25 {strides = array<i32>} : memref<16x128xf32, #tpu.memory_space<vmem>>, vector<16x128xf32>,
    } else {
    }
    return
  }
  func.func @transform_0(%arg0: i32, %arg1: i32, %arg2: i32) -> (i32, i32) {
    %c0_i32 = arith.constant 0 : i32
    return %arg0, %arg2 : i32, i32
  }
  func.func @transform_1(%arg0: i32, %arg1: i32, %arg2: i32) -> (i32, i32) {
    %c0_i32 = arith.constant 0 : i32
    return %arg1, %arg2 : i32, i32
  }
  func.func @transform_2(%arg0: i32, %arg1: i32, %arg2: i32) -> (i32, i32) {
    %c0_i32 = arith.constant 0 : i32
    %c0_i32_0 = arith.constant 0 : i32
    return %c0_i32, %arg2 : i32, i32
  }
  func.func @transform_3(%arg0: i32, %arg1: i32, %arg2: i32) -> (i32, i32) {
    %c0_i32 = arith.constant 0 : i32
    %c0_i32_0 = arith.constant 0 : i32
    return %arg1, %c0_i32 : i32, i32
  }
  func.func @transform_4(%arg0: i32, %arg1: i32, %arg2: i32) -> (i32, i32) {
    %c0_i32 = arith.constant 0 : i32
    %c0_i32_0 = arith.constant 0 : i32
    return %c0_i32, %arg1 : i32, i32
  }
  func.func @transform_5(%arg0: i32, %arg1: i32, %arg2: i32) -> (i32, i32) {
    %c0_i32 = arith.constant 0 : i32
    return %arg0, %arg1 : i32, i32
  }
}

</mosaic_0001>

<bundles_post_ra>
// kernel: tpu_custom_call.1
= control target key start
LH: loop header
LB: loop body
LE: loop exit
PB: predicated region body
PF: predicated region fallthrough
CT: control target
= control target key end

     0   :  { %10 = vsyncpa [#allocation5], 0  ;;  %s665_s0 = inlined_call_operand.hbm [shape: bf16[16,128], index: 0, kind: input, shape index: {}]   ;;  %s666_s1 = inlined_call_operand.vmem [shape: bf16[128,128], index: 1, kind: input, shape index: {}]   ;;  %s667_s2 = inlined_call_operand.vmem [shape: bf16[8,128], index: 2, kind: input, shape index: {}]   ;;  %s668_s3 = inlined_call_operand.vmem [shape: bf16[128,8], index: 3, kind: input, shape index: {}]   ;;  %s669_s4 = inlined_call_operand.vmem [shape: f32[1,128], index: 4, kind: input, shape index: {}]   ;;  %s670_s5 = inlined_call_operand.hbm [shape: f32[16,128], index: 5, kind: output, shape index: {}]  }
   0x1   :  { %11 = vsyncpa [#allocation6], 0  ;;  %s533_s18 = smov [#allocation4]   ;;  %s485_s22 = scalar_lea.hbm %s665_s0, 128 }
   0x2   :  { %s17_s19 = sshll.u32 %s533_s18, 4  ;;  %p486_p0 = scmp.ne.s32.totalorder %s665_s0, %s485_s22  ;;  %s18_s19 = int_to_ptr.vmem [resolvable:$true] %s17_s19 }
   0x3   :  { %p489_p1 = scmp.lt.u32.totalorder %s485_s22, %s665_s0 }
   0x5   :  { %p491_p2 = pnand %p489_p1, %p486_p0 }
   0x7   :  { %494 = shalt.err (!%p491_p2)
}
   0x8   :  { %s495_s27 = scalar_lea.vmem %s18_s19, 128  ;;  %p500_p4 = scmp.lt.s32.totalorder %s18_s19, %s18_s19 }
   0x9   :  { %p496_p3 = scmp.ne.s32.totalorder %s18_s19, %s495_s27  ;;  %p501_p5 = scmp.lt.s32.totalorder %s495_s27, %s495_s27 }
   0xb   :  { %p502_p6 = por %p501_p5, %p500_p4 }
   0xd   :  { %p503_p7 = pnand %p502_p6, %p496_p3 }
   0xf   :  { %506 = shalt.err (!%p503_p7)
}
  0x10   :  { %s534_s28 = smov 64   ;;  %s535_s29 = smov 4  }
  0x11   :  { %23 = dma.hbm_to_vmem [thread:$0]  %s665_s0, 128, %s18_s19, [#allocation5], %s534_s28, %s534_s28, %s535_s29  }
  0x12   :  { %529 = dma.done.wait [#allocation5], 128  }
  0x13   :  { %530 = vsyncadd [#allocation5], 4294967168  ;;  %vm42_vm0 = vcmask 64512   ;;  %v536_v0 = vmov 0.0   ;;  %vm537_vm1 = vmmov 0   ;;  %v469_v2 = vld [vmem:[%s666_s1] sm:$0xff]  }
  0x14   :  { %434 = vmatprep.subr.bf16.mxu1 %v536_v0  ;;  %436 = vmatprep.mubr.msk.bf16.mxu1 %vm537_vm1, %v536_v0  ;;  %43 = vst.msk [vmem:[#allocation3] sm:$0xff] %vm42_vm0, %v536_v0  ;;  %44 = vst.msk [vmem:[#allocation3 + $0x8] sm:$0xff] %vm42_vm0, %v536_v0  ;;  %v166_v1 = vld [vmem:[%s667_s2] sm:$0xf]  ;;  %v468_v4 = vld [vmem:[#allocation4] sm:$0xff]   ;;  %s538_s13 = smov [#allocation7]  }
  0x15   :  { %414 = vmatprep.subr.bf16.mxu0 %v536_v0  ;;  %430 = vmatprep.mubr.msk.bf16.mxu0 %vm537_vm1, %v536_v0  ;;  %v470_v3 = vld [vmem:[%s668_s3] sm:$0xff]   ;;  %v471_v6 = vld [vmem:[%s666_s1 + $0x8] sm:$0xff]   ;;  %v473_v9 = vld [vmem:[%s666_s1 + $0x10] sm:$0xff]   ;;  %s363_s2 = sshll.u32 %s538_s13, 4  ;;  %s364_s2 = int_to_ptr.vmem [resolvable:$true] %s363_s2 }
  0x16   :  { %435 = vmatpush3.bf16.xpose.msra.mxu1 %v166_v1  ;;  %415 = vmatpush3.bf16.xpose.msra.mxu0 %v469_v2  ;;  %v279_v5 = vsel %vm42_vm0, %v470_v3, 0  ;;  %v472_v7 = vld [vmem:[%s668_s3 + $0x8] sm:$0xff]   ;;  %v474_v10 = vld [vmem:[%s668_s3 + $0x10] sm:$0xff]   ;;  %v475_v12 = vld [vmem:[%s666_s1 + $0x18] sm:$0xff]   ;;  %s507_s14 = scalar_lea.vmem %s364_s2, 256  ;;  %p512_p9 = scmp.lt.s32.totalorder %s364_s2, %s364_s2 }
  0x17   :  { %440 = vmatprep.subr.bf16.mxu1 %v536_v0  ;;  %416 = vmatprep.subr.bf16.mxu0 %v536_v0  ;;  %v282_v8 = vsel %vm42_vm0, %v472_v7, 0  ;;  %v285_v11 = vsel %vm42_vm0, %v474_v10, 0  ;;  %v476_v13 = vld [vmem:[%s668_s3 + $0x18] sm:$0xff]   ;;  %v477_v15 = vld [vmem:[%s666_s1 + $0x20] sm:$0xff]   ;;  %v479_v18 = vld [vmem:[%s666_s1 + $0x28] sm:$0xff]   ;;  %p508_p8 = scmp.ne.s32.totalorder %s364_s2, %s507_s14  ;;  %p513_p10 = scmp.lt.s32.totalorder %s507_s14, %s507_s14 }
  0x18   :  { %v288_v14 = vsel %vm42_vm0, %v476_v13, 0  ;;  %v478_v16 = vld [vmem:[%s668_s3 + $0x20] sm:$0xff]   ;;  %v480_v19 = vld [vmem:[%s668_s3 + $0x28] sm:$0xff]   ;;  %v481_v21 = vld [vmem:[%s666_s1 + $0x30] sm:$0xff]  }
  0x19   :  { %v291_v17 = vsel %vm42_vm0, %v478_v16, 0  ;;  %v294_v20 = vsel %vm42_vm0, %v480_v19, 0  ;;  %v482_v22 = vld [vmem:[%s668_s3 + $0x30] sm:$0xff]   ;;  %v483_v24 = vld [vmem:[%s666_s1 + $0x38] sm:$0xff]   ;;  %v393_v43 = vld [vmem:[%s669_s4] ss:$0 sm:$0xff]  ;;  %p514_p11 = por %p513_p10, %p512_p9 }
  0x1a   :  { %v297_v23 = vsel %vm42_vm0, %v482_v22, 0  ;;  %v484_v25 = vld [vmem:[%s668_s3 + $0x38] sm:$0xff]  }
  0x1b   :  { %v300_v26 = vsel %vm42_vm0, %v484_v25, 0  ;;  %v164_v27 = vld [vmem:[#allocation3] sm:$0xff]  ;;  %v165_v29 = vld [vmem:[#allocation3 + $0x8] sm:$0xff]  ;;  %p515_p12 = pnand %p514_p11, %p508_p8 }
  0x1d   :  { %437 = vmatmul.mubr.bf16.vlgmr.msra.gmra.mrb[0].mxu1 %v468_v4 }
  0x1e   :  { %441 = vmatpush3.bf16.xpose.msra.mxu1 %v279_v5  ;;  %456 = vmatprep.mubr.msk.bf16.mxu1 %vm537_vm1, %v536_v0 }
  0x1f   :  { %442 = vmatprep.subr.bf16.mxu1 %v536_v0  ;;  %417 = vmatpush3.bf16.xpose.msra.mxu0 %v471_v6 }
  0x20   :  { %418 = vmatprep.subr.bf16.mxu0 %v536_v0 }
  0x26   :  { %443 = vmatpush3.bf16.xpose.msra.mxu1 %v282_v8 }
  0x27   :  { %444 = vmatprep.subr.bf16.mxu1 %v536_v0  ;;  %419 = vmatpush3.bf16.xpose.msra.mxu0 %v473_v9 }
  0x28   :  { %420 = vmatprep.subr.bf16.mxu0 %v536_v0 }
  0x2e   :  { %445 = vmatpush3.bf16.xpose.msra.mxu1 %v285_v11 }
  0x2f   :  { %446 = vmatprep.subr.bf16.mxu1 %v536_v0  ;;  %421 = vmatpush3.bf16.xpose.msra.mxu0 %v475_v12 }
  0x30   :  { %422 = vmatprep.subr.bf16.mxu0 %v536_v0 }
  0x36   :  { %447 = vmatpush3.bf16.xpose.msra.mxu1 %v288_v14 }
  0x37   :  { %448 = vmatprep.subr.bf16.mxu1 %v536_v0  ;;  %423 = vmatpush3.bf16.xpose.msra.mxu0 %v477_v15 }
  0x38   :  { %424 = vmatprep.subr.bf16.mxu0 %v536_v0 }
  0x3e   :  { %449 = vmatpush3.bf16.xpose.msra.mxu1 %v291_v17 }
  0x3f   :  { %450 = vmatprep.subr.bf16.mxu1 %v536_v0  ;;  %425 = vmatpush3.bf16.xpose.msra.mxu0 %v479_v18 }
  0x40   :  { %426 = vmatprep.subr.bf16.mxu0 %v536_v0 }
  0x46   :  { %451 = vmatpush3.bf16.xpose.msra.mxu1 %v294_v20 }
  0x47   :  { %452 = vmatprep.subr.bf16.mxu1 %v536_v0  ;;  %427 = vmatpush3.bf16.xpose.msra.mxu0 %v481_v21 }
  0x48   :  { %428 = vmatprep.subr.bf16.mxu0 %v536_v0 }
  0x4e   :  { %453 = vmatpush3.bf16.xpose.msra.mxu1 %v297_v23 }
  0x4f   :  { %454 = vmatprep.subr.bf16.mxu1 %v536_v0  ;;  %429 = vmatpush3.bf16.xpose.msra.mxu0 %v483_v24 }
  0x56   :  { %455 = vmatpush3.bf16.xpose.msra.mxu1 %v300_v26  ;;  %431 = vmatmul.mubr.bf16.vlgmr.msra.gmra.mrb[0].mxu0 %v468_v4 }
  0xf0   :  { %v201_v28 = vpop.f32.mrb[0].mxu1 }
  0xf1   :  { %v208_v30 = vadd.f32 %v201_v28, %v164_v27  ;;  %v438_v31 = vpop.f32.mrb[1].mxu1 }
  0xf2   :  { %v204_v32 = vpop.f32.mrb[2].mxu1 }
  0xf3   :  { %211 = vst.msk [vmem:[#allocation3] sm:$0xff] %vm42_vm0, %v208_v30  ;;  %v209_v33 = vadd.f32 %v204_v32, %v165_v29  ;;  %v439_v34 = vpop.f32.mrb[3].mxu1 }
  0xf5   :  { %212 = vst.msk [vmem:[#allocation3 + $0x8] sm:$0xff] %vm42_vm0, %v209_v33 }
  0xfa   :  { %v216_v35 = vld [vmem:[#allocation3] sm:$0xff] }
  0xfc   :  { %v217_v36 = vld [vmem:[#allocation3 + $0x8] sm:$0xff] }
  0xfd   :  { %v218_v37 = vpack.c.bf16 %v217_v36, %v216_v35 }
  0xff   :  { %457 = vmatmul.mubr.msk.bf16.vlgmr.msra.gmra.mrb[4].mxu1 %vm42_vm0, %v218_v37 }
 0x129   :  { %v153_v38 = vpop.f32.mrb[0].mxu0 }
 0x12a   :  { %v432_v39 = vpop.f32.mrb[1].mxu0 }
 0x12b   :  { %v156_v40 = vpop.f32.mrb[2].mxu0 }
 0x12c   :  { %v433_v41 = vpop.f32.mrb[3].mxu0 }
 0x1d2   :  { %v336_v42 = vpop.f32.mrb[4].mxu1 }
 0x1d3   :  { %v345_v44 = vadd.f32 %v336_v42, %v153_v38  ;;  %v458_v45 = vpop.f32.mrb[5].mxu1 }
 0x1d4   :  { %v339_v46 = vpop.f32.mrb[6].mxu1 }
 0x1d5   :  { %v354_v47 = vadd.f32 %v393_v43, %v345_v44  ;;  %v346_v48 = vadd.f32 %v339_v46, %v156_v40  ;;  %v459_v49 = vpop.f32.mrb[7].mxu1 }
 0x1d7   :  { %356 = vst [vmem:[#allocation7] sm:$0xff] %v354_v47  ;;  %v355_v50 = vadd.f32 %v393_v43, %v346_v48 }
 0x1d9   :  { %357 = vst [vmem:[#allocation7 + $0x8] sm:$0xff] %v355_v50 }
 0x1da   :  { %518 = shalt.err (!%p515_p12)
}
 0x1db   :  { %s519_s16 = scalar_lea.hbm %s670_s5, 256 }
 0x1dc   :  { %p520_p13 = scmp.ne.s32.totalorder %s670_s5, %s519_s16  ;;  %p523_p0 = scmp.lt.u32.totalorder %s519_s16, %s670_s5 }
 0x1de   :  { %p525_p1 = pnand %p523_p0, %p520_p13 }
 0x1e0   :  { %528 = shalt.err (!%p525_p1)
}
 0x1e1   :  { %s539_s21 = smov 128   ;;  %s540_s22 = smov 8  }
 0x1e2   :  { %369 = dma.vmem_to_hbm [thread:$0]  %s364_s2, 256, %s670_s5, [#allocation6], %s539_s21, %s539_s21, %s540_s22  }
 0x1e3   :  { %531 = dma.done.wait [#allocation6], 256  }
 0x1e4   :  { %532 = vsyncadd [#allocation6], 4294967040 }
 0x1e5   :  { %373 = vsyncpa [#allocation5], 1 }
 0x1e6   :  { %374 = vsyncpa [#allocation6], 1 }

</bundles_post_ra>
